<compile_context>
chip_gen: v5e
topology: v5e:2x2
jax: 0.10.0
libtpu: 0.0.40
codegen_flags: <defaults>
</compile_context>

<pallas_src>
import functools

import jax
import jax.numpy as jnp
from jax.experimental import pallas as pl
from jax.experimental.pallas import tpu as pltpu

IN_FEATURES = 10
OUT_FEATURES = 5
OUT_PAD = 8          # pad 5 -> 8 output columns: aligned 32 B/row HBM stores


def _cdiv(a, b):
    return -(-a // b)


def _round_up(n, m):
    return _cdiv(n, m) * m


def linear_relu_kernel(x_ref, w_ref, b_ref, o_ref):
    # MXU matmul + VPU bias-add + ReLU, fused. K=10 / N=8 leaves the MXU with
    # enormous slack; the kernel is HBM-roofline bound, so no matmul tuning.
    x = x_ref[...]                                             # (TB, 10)
    w = w_ref[...]                                             # (10, 8) zero-padded cols
    b = b_ref[...]                                             # (1, 8)  zero-padded
    y = jnp.dot(x, w, preferred_element_type=jnp.float32) + b  # (TB, 8) f32
    o_ref[...] = jnp.maximum(y, 0.0).astype(o_ref.dtype)


def prepare_params(w, b):
    """One-time prep: pad (10, 5) weight / (5,) bias to 8 output columns."""
    out = w.shape[1]
    w_pad = jnp.zeros((w.shape[0], OUT_PAD), w.dtype).at[:, :out].set(w)
    b_pad = jnp.zeros((1, OUT_PAD), b.dtype).at[0, :out].set(b)
    return w_pad, b_pad


@functools.lru_cache(maxsize=1)
def _tile_cap():
    """Generation-aware batch-tile cap that fits the default scoped-VMEM limit."""
    try:
        kind = jax.devices()[0].device_kind.lower()
    except Exception:  # pragma: no cover
        return 4096
    # v5e (and older) default scoped VMEM is 16 MiB -> cap 4096 (~8 MiB of tiles).
    # v6e / v7x default is 32 MiB -> cap 8192 (~16 MiB of tiles).
    if any(tag in kind for tag in ("v2", "v3", "v4", "v5")):
        return 4096
    return 8192


def _choose_tile(B, cap):
    """Batch tile: multiple of 8, <= cap, and an even (>=2) step count when B > 8
    so the 'parallel' grid axis splits evenly across v7x's two TensorCores."""
    if B <= 8:
        return 8
    n = max(_cdiv(B, cap), 2)
    if n % 2:
        n += 1
    return min(_round_up(_cdiv(B, n), 8), cap)


@jax.jit
def base_model_forward(x, w_pad, b_pad):
    """x: (B, 10) f32, w_pad: (10, 8) f32, b_pad: (1, 8) f32 -> (B, 5) f32."""
    B, IN = x.shape
    TB = _choose_tile(B, _tile_cap())

    out8 = pl.pallas_call(
        linear_relu_kernel,
        out_shape=jax.ShapeDtypeStruct((B, OUT_PAD), jnp.float32),
        grid=(_cdiv(B, TB),),  # ragged last block: OOB reads dropped on write
        in_specs=[
            # (TB, 10) block is legal because 10 equals the full feature extent.
            pl.BlockSpec((TB, IN), lambda i: (i, 0)),
            pl.BlockSpec((IN, OUT_PAD), lambda i: (0, 0)),   # tiny weight, resident
            pl.BlockSpec((1, OUT_PAD), lambda i: (0, 0)),    # tiny bias, resident
        ],
        # OUT_PAD == full array extent -> legal narrow block; only 32 B/row to HBM.
        out_specs=pl.BlockSpec((TB, OUT_PAD), lambda i: (i, 0)),
        compiler_params=pltpu.CompilerParams(
            # Batch axis is independent -> megacore-shardable on v7x,
            # measured near-neutral on v5e/v6e.
            dimension_semantics=("parallel",),
        ),
    )(x, w_pad, b_pad)

    # Cheap final slice: 32 B/row read -> 20 B/row write (vs 512 B/row before).
    return out8[:, :OUT_FEATURES]


if __name__ == "__main__":
    key = jax.random.PRNGKey(0)
    k_x, k_w, k_b = jax.random.split(key, 3)

    B = 8  # small demo batch; wrapper handles arbitrary (ragged) B

    # Deterministic synthetic params (mimic PyTorch uniform init range 1/sqrt(in)).
    bound = 1.0 / (IN_FEATURES ** 0.5)
    w = jax.random.uniform(k_w, (IN_FEATURES, OUT_FEATURES), jnp.float32, -bound, bound)
    b = jax.random.uniform(k_b, (OUT_FEATURES,), jnp.float32, -bound, bound)
    x = jax.random.normal(k_x, (B, IN_FEATURES), jnp.float32)

    w_pad, b_pad = prepare_params(w, b)  # one-time, outside the per-call path

    out = base_model_forward(x, w_pad, b_pad)
    jax.block_until_ready(out)
    ref = jnp.maximum(x @ w + b, 0.0)
    assert out.shape == (B, OUT_FEATURES)
    assert jnp.allclose(out, ref, atol=1e-5, rtol=1e-5)

    # Extra sanity check on a ragged batch (exercises the masked last block).
    x2 = jax.random.normal(k_x, (37, IN_FEATURES), jnp.float32)
    out2 = base_model_forward(x2, w_pad, b_pad)
    jax.block_until_ready(out2)
    ref2 = jnp.maximum(x2 @ w + b, 0.0)
    assert out2.shape == (37, OUT_FEATURES)
    assert jnp.allclose(out2, ref2, atol=1e-5, rtol=1e-5)

    print("KERNEL_OK")
</pallas_src>

<mosaic_0001>
module attributes {stable_mosaic.version = 11 : i64} {
  func.func @linear_relu_kernel(%arg0: i32, %arg1: memref<8x10xf32, #tpu.memory_space<vmem>>, %arg2: memref<10x8xf32, #tpu.memory_space<vmem>>, %arg3: memref<1x8xf32, #tpu.memory_space<vmem>>, %arg4: memref<8x8xf32, #tpu.memory_space<vmem>>) attributes {dimension_semantics = [#tpu.dimension_semantics<parallel>], iteration_bounds = array<i64: 1>, scalar_prefetch = 0 : i64, scratch_operands = 0 : i64, tpu.core_type = #tpu.core_type<tc>, window_params = [{transform_indices = @transform_0, window_bounds = array<i64: 8, 10>}, {pipeline_mode = #tpu.pipeline_mode<synchronous>, transform_indices = @transform_1, window_bounds = array<i64: 10, 8>}, {pipeline_mode = #tpu.pipeline_mode<synchronous>, transform_indices = @transform_2, window_bounds = array<i64: 1, 8>}, {transform_indices = @transform_3, window_bounds = array<i64: 8, 8>}]} {
    %c0 = arith.constant 0 : index
    %c0_0 = arith.constant 0 : index
    %0 = vector.load %arg1[%c0, %c0_0] : memref<8x10xf32, #tpu.memory_space<vmem>>, vector<8x10xf32>
    %c0_1 = arith.constant 0 : index
    %c0_2 = arith.constant 0 : index
    %1 = vector.load %arg2[%c0_1, %c0_2] : memref<10x8xf32, #tpu.memory_space<vmem>>, vector<10x8xf32>
    %c0_3 = arith.constant 0 : index
    %c0_4 = arith.constant 0 : index
    %2 = vector.load %arg3[%c0_3, %c0_4] : memref<1x8xf32, #tpu.memory_space<vmem>>, vector<1x8xf32>
    %cst = arith.constant dense<0.000000e+00> : vector<8x8xf32>
    %3 = tpu.matmul %0, %1, %cst {dimension_numbers = #tpu.dot_dimension_numbers<[1], [0], [0], [1], [0, 0, 1, 1], [], []>} : vector<8x10xf32>, vector<10x8xf32>, vector<8x8xf32> -> vector<8x8xf32>
    %4 = vector.broadcast %2 : vector<1x8xf32> to vector<8x8xf32>
    %5 = arith.addf %3, %4 : vector<8x8xf32>
    %cst_5 = arith.constant 0.000000e+00 : f32
    %6 = vector.broadcast %cst_5 : f32 to vector<8x8xf32>
    %7 = arith.maximumf %5, %6 : vector<8x8xf32>
    %c0_6 = arith.constant 0 : index
    %c0_7 = arith.constant 0 : index
    %8 = vector.load %arg4[%c0_6, %c0_7] : memref<8x8xf32, #tpu.memory_space<vmem>>, vector<8x8xf32>
    tpu.vector_store %arg4[%c0_6, %c0_7], %7 {strides = array<i32>} : memref<8x8xf32, #tpu.memory_space<vmem>>, vector<8x8xf32>,
    return
  }
  func.func @transform_0(%arg0: i32) -> (i32, i32) {
    %c0_i32 = arith.constant 0 : i32
    %c0_i32_0 = arith.constant 0 : i32
    return %arg0, %c0_i32 : i32, i32
  }
  func.func @transform_1(%arg0: i32) -> (i32, i32) {
    %c0_i32 = arith.constant 0 : i32
    %c0_i32_0 = arith.constant 0 : i32
    %c0_i32_1 = arith.constant 0 : i32
    return %c0_i32, %c0_i32_0 : i32, i32
  }
  func.func @transform_2(%arg0: i32) -> (i32, i32) {
    %c0_i32 = arith.constant 0 : i32
    %c0_i32_0 = arith.constant 0 : i32
    %c0_i32_1 = arith.constant 0 : i32
    return %c0_i32, %c0_i32_0 : i32, i32
  }
  func.func @transform_3(%arg0: i32) -> (i32, i32) {
    %c0_i32 = arith.constant 0 : i32
    %c0_i32_0 = arith.constant 0 : i32
    return %arg0, %c0_i32 : i32, i32
  }
}

</mosaic_0001>

<bundles_post_ra>
// kernel: base_model_forward.1
= control target key start
LH: loop header
LB: loop body
LE: loop exit
PB: predicated region body
PF: predicated region fallthrough
CT: control target
= control target key end

     0   :  { %vm26_vm0 = vcmask 1041408   ;;  %vm22_vm1 = vcmask 80896   ;;  %s135_s0 = inlined_call_operand.vmem [shape: f32[8,10], index: 0, kind: input, shape index: {}]   ;;  %s136_s1 = inlined_call_operand.vmem [shape: f32[10,8], index: 1, kind: input, shape index: {}]   ;;  %s137_s2 = inlined_call_operand.vmem [shape: f32[1,8], index: 2, kind: input, shape index: {}]   ;;  %s138_s3 = inlined_call_operand.hbm [shape: f32[8,8], index: 3, kind: output, shape index: {}]  }
   0x1   :  { %v17_v0 = vld [vmem:[%s136_s1 + $0x8] sm:$0x3]  ;;  %v16_v1 = vld [vmem:[%s136_s1] sm:$0xff] }
   0x2   :  { %69 = vmatpush.msk.msra.mxu0 %vm26_vm0, %v17_v0  ;;  %v15_v2 = vld [vmem:[%s135_s0] sm:$0xff] }
   0x3   :  { %8 = vsyncpa [#allocation3], 0  ;;  %v72_v3 = vld [vmem:[%s137_s2] ss:$0 sm:$0xff]  ;;  %s99_s20 = smov [#allocation2]   ;;  %s60_s1 = sshll.u32 %s138_s3, 4  ;;  %s61_s1 = int_to_ptr.hbm [resolvable:$true] %s60_s1 }
   0x4   :  { %45 = vmatpush.msra.mxu0 %v16_v1  ;;  %s58_s21 = sshll.u32 %s99_s20, 4  ;;  %vm51_vm2 = vcmask 64512   ;;  %s59_s21 = int_to_ptr.vmem [resolvable:$true] %s58_s21 }
   0x5   :  { %70 = vmatmul.msk.f32.vlgmr.msra.gmra.mxu0 %vm22_vm1, %v15_v2 }
  0x82   :  { %v47_v4 = vpop.f32.mrf.mxu0 }
  0x83   :  { %v48_v5 = vadd.f32 %v72_v3, %v47_v4 }
  0x85   :  { %v50_v6 = vmax.f32 %v48_v5, 0.0 }
  0x87   :  { %52 = vst.msk [vmem:[#allocation2] sm:$0xff] %vm51_vm2, %v50_v6 }
  0x88   :  { %63 = dma.vmem_to_hbm [thread:$0]  %s59_s21, 128, %s61_s1, [#allocation3]  }
  0x89   :  { %97 = dma.done.wait [#allocation3], 128  }
  0x8a   :  { %98 = vsyncadd [#allocation3], 4294967168 }
  0x8b   :  { %68 = vsyncpa [#allocation3], 1 }

</bundles_post_ra>
